<compile_context>
chip_gen: v6e
topology: v6e:2x2x1
jax: 0.10.0
libtpu: 0.0.40
codegen_flags: <defaults>
</compile_context>

<pallas_src>
import functools

import jax
import jax.numpy as jnp
from jax import lax
from jax.experimental import pallas as pl
from jax.experimental.pallas import tpu as pltpu


def _pick_tile_rows(B: int, D: int, itemsize: int) -> int:
    """Rows per tile: 2 inputs x 2 buffers x TB x D x itemsize <= ~8 MiB."""
    budget = 8 * 1024 * 1024
    tb = budget // max(1, 4 * D * itemsize)
    tb = int(max(8, min(1024, tb)))
    tb -= tb % 8                      # sublane-aligned block rows
    if tb >= B:
        return B                      # single full-extent tile (always legal)
    return tb


def _contrastive_kernel(o1_ref, o2_ref, t_ref, dist_ref, loss_ref,
                        *, margin: float, total_rows: int, tile_rows: int):
    o1 = o1_ref[...].astype(jnp.float32)            # (TB, D)
    o2 = o2_ref[...].astype(jnp.float32)            # (TB, D)
    tgt = t_ref[...].astype(jnp.float32)            # (TB, 1)

    # Cosine similarity along the feature axis.
    # torch CosineSimilarity(dim=1, eps=1e-8): x1.x2 / max(||x1||*||x2||, eps).
    # sqrt(max(ss1*ss2, eps^2)) == max(||x1||*||x2||, eps), done via rsqrt (EUP).
    dot = jnp.sum(o1 * o2, axis=-1, keepdims=True)  # (TB, 1)
    ss1 = jnp.sum(o1 * o1, axis=-1, keepdims=True)  # (TB, 1)
    ss2 = jnp.sum(o2 * o2, axis=-1, keepdims=True)  # (TB, 1)

    eps = jnp.float32(1e-8)
    inv_denom = lax.rsqrt(jnp.maximum(ss1 * ss2, eps * eps))
    dist = dot * inv_denom                          # (TB, 1)

    # losses = (1-t)*relu(margin - d)^2 + t*(1-d)^2/4
    m = jnp.float32(margin)
    pos = jnp.maximum(m - dist, 0.0)
    one_minus = 1.0 - dist
    losses = (1.0 - tgt) * pos * pos + tgt * one_minus * one_minus * 0.25

    # Mask tail rows of a partial final tile so the wrapper sum is exact.
    row0 = pl.program_id(0) * tile_rows
    row_ids = row0 + lax.broadcasted_iota(jnp.int32, losses.shape, 0)
    losses = jnp.where(row_ids < total_rows, losses, 0.0)

    dist_ref[...] = dist
    loss_ref[...] = losses


def contrastive_loss(output1, output2, target, *, margin=0.5, size_average=True):
    """Pallas implementation of ContrastiveLoss.forward.

    output1, output2: (B, D) float arrays (f32 or bf16).
    target:           (B,) array (0/1 labels; cast to float inside).
    Returns (loss_scalar, distances) matching the PyTorch module.
    """
    B, D = output1.shape
    itemsize = jnp.dtype(output1.dtype).itemsize
    TB = _pick_tile_rows(B, D, itemsize)
    num_tiles = pl.cdiv(B, TB)

    target2d = target.astype(jnp.float32).reshape(B, 1)

    kernel = functools.partial(
        _contrastive_kernel,
        margin=float(margin), total_rows=B, tile_rows=TB,
    )

    grid_spec = pltpu.PrefetchScalarGridSpec(
        num_scalar_prefetch=0,
        grid=(num_tiles,),
        in_specs=[
            pl.BlockSpec((TB, D), lambda i: (i, 0)),   # output1 tile
            pl.BlockSpec((TB, D), lambda i: (i, 0)),   # output2 tile
            pl.BlockSpec((TB, 1), lambda i: (i, 0)),   # target tile
        ],
        out_specs=(
            pl.BlockSpec((TB, 1), lambda i: (i, 0)),   # per-row cosine sims
            pl.BlockSpec((TB, 1), lambda i: (i, 0)),   # per-row (masked) losses
        ),
    )

    cost = pl.CostEstimate(
        flops=6 * B * D + 12 * B,
        transcendentals=B,
        bytes_accessed=2 * B * D * itemsize + 3 * B * 4,
    )

    dist, losses = pl.pallas_call(
        kernel,
        out_shape=(
            jax.ShapeDtypeStruct((B, 1), jnp.float32),
            jax.ShapeDtypeStruct((B, 1), jnp.float32),
        ),
        grid_spec=grid_spec,
        compiler_params=pltpu.CompilerParams(
            dimension_semantics=("parallel",),       # batch tiles are independent
            vmem_limit_bytes=32 * 1024 * 1024,       # safe on v5e/v6e/v7x
        ),
        cost_estimate=cost,
    )(output1, output2, target2d)

    total = jnp.sum(losses)
    loss = total / jnp.float32(B) if size_average else total
    return loss, dist[:, 0]


def _reference(output1, output2, target, margin=0.5, size_average=True):
    """Plain-JAX reference mirroring the PyTorch forward."""
    eps = 1e-8
    o1 = output1.astype(jnp.float32)
    o2 = output2.astype(jnp.float32)
    t = target.astype(jnp.float32)
    dot = jnp.sum(o1 * o2, axis=1)
    n1 = jnp.sqrt(jnp.sum(o1 * o1, axis=1))
    n2 = jnp.sqrt(jnp.sum(o2 * o2, axis=1))
    d = dot / jnp.maximum(n1 * n2, eps)
    losses = (1.0 - t) * jnp.square(jnp.maximum(margin - d, 0.0)) \
             + t * jnp.square(1.0 - d) / 4.0
    loss = jnp.mean(losses) if size_average else jnp.sum(losses)
    return loss, d


if __name__ == "__main__":
    key = jax.random.PRNGKey(0)
    k1, k2, k3 = jax.random.split(key, 3)

    B, D = 8, 32
    output1 = jax.random.normal(k1, (B, D), dtype=jnp.float32)
    output2 = jax.random.normal(k2, (B, D), dtype=jnp.float32)
    target = jax.random.bernoulli(k3, 0.5, (B,)).astype(jnp.int32)

    loss, dist = contrastive_loss(output1, output2, target,
                                  margin=0.5, size_average=True)
    jax.block_until_ready((loss, dist))

    ref_loss, ref_dist = _reference(output1, output2, target)
    assert jnp.allclose(loss, ref_loss, atol=1e-5, rtol=1e-5), (loss, ref_loss)
    assert jnp.allclose(dist, ref_dist, atol=1e-5, rtol=1e-5)

    # Also exercise size_average=False (sum reduction).
    loss_s, dist_s = contrastive_loss(output1, output2, target,
                                      margin=0.5, size_average=False)
    ref_loss_s, _ = _reference(output1, output2, target, size_average=False)
    jax.block_until_ready((loss_s, dist_s))
    assert jnp.allclose(loss_s, ref_loss_s, atol=1e-5, rtol=1e-5)

    print("KERNEL_OK")
</pallas_src>

<mosaic_0001>
module attributes {stable_mosaic.version = 11 : i64} {
  func.func @_contrastive_kernel(%arg0: i32, %arg1: memref<8x32xf32, #tpu.memory_space<vmem>>, %arg2: memref<8x32xf32, #tpu.memory_space<vmem>>, %arg3: memref<8x1xf32, #tpu.memory_space<vmem>>, %arg4: memref<8x1xf32, #tpu.memory_space<vmem>>, %arg5: memref<8x1xf32, #tpu.memory_space<vmem>>) attributes {dimension_semantics = [#tpu.dimension_semantics<parallel>], iteration_bounds = array<i64: 1>, scalar_prefetch = 0 : i64, scratch_operands = 0 : i64, tpu.core_type = #tpu.core_type<tc>, window_params = [{transform_indices = @transform_0, window_bounds = array<i64: 8, 32>}, {transform_indices = @transform_1, window_bounds = array<i64: 8, 32>}, {transform_indices = @transform_2, window_bounds = array<i64: 8, 1>}, {transform_indices = @transform_3, window_bounds = array<i64: 8, 1>}, {transform_indices = @transform_4, window_bounds = array<i64: 8, 1>}]} {
    %c0 = arith.constant 0 : index
    %c0_0 = arith.constant 0 : index
    %0 = vector.load %arg1[%c0, %c0_0] : memref<8x32xf32, #tpu.memory_space<vmem>>, vector<8x32xf32>
    %c0_1 = arith.constant 0 : index
    %c0_2 = arith.constant 0 : index
    %1 = vector.load %arg2[%c0_1, %c0_2] : memref<8x32xf32, #tpu.memory_space<vmem>>, vector<8x32xf32>
    %c0_3 = arith.constant 0 : index
    %c0_4 = arith.constant 0 : index
    %2 = vector.load %arg3[%c0_3, %c0_4] : memref<8x1xf32, #tpu.memory_space<vmem>>, vector<8x1xf32>
    %3 = arith.mulf %0, %1 : vector<8x32xf32>
    %cst = arith.constant dense<0.000000e+00> : vector<8xf32>
    %4 = vector.multi_reduction <add>, %3, %cst [1] : vector<8x32xf32> to vector<8xf32>
    %5 = vector.shape_cast %4 : vector<8xf32> to vector<8x1xf32>
    %6 = arith.mulf %0, %0 : vector<8x32xf32>
    %cst_5 = arith.constant dense<0.000000e+00> : vector<8xf32>
    %7 = vector.multi_reduction <add>, %6, %cst_5 [1] : vector<8x32xf32> to vector<8xf32>
    %8 = vector.shape_cast %7 : vector<8xf32> to vector<8x1xf32>
    %9 = arith.mulf %1, %1 : vector<8x32xf32>
    %cst_6 = arith.constant dense<0.000000e+00> : vector<8xf32>
    %10 = vector.multi_reduction <add>, %9, %cst_6 [1] : vector<8x32xf32> to vector<8xf32>
    %11 = vector.shape_cast %10 : vector<8xf32> to vector<8x1xf32>
    %12 = arith.mulf %8, %11 : vector<8x1xf32>
    %cst_7 = arith.constant 9.99999993E-9 : f32
    %cst_8 = arith.constant 9.99999993E-9 : f32
    %13 = arith.mulf %cst_7, %cst_8 : f32
    %14 = vector.broadcast %13 : f32 to vector<8x1xf32>
    %15 = arith.maximumf %12, %14 : vector<8x1xf32>
    %16 = math.rsqrt %15 : vector<8x1xf32>
    %17 = arith.mulf %5, %16 : vector<8x1xf32>
    %cst_9 = arith.constant 5.000000e-01 : f32
    %18 = vector.broadcast %cst_9 : f32 to vector<8x1xf32>
    %19 = arith.subf %18, %17 : vector<8x1xf32>
    %cst_10 = arith.constant 0.000000e+00 : f32
    %20 = vector.broadcast %cst_10 : f32 to vector<8x1xf32>
    %21 = arith.maximumf %19, %20 : vector<8x1xf32>
    %cst_11 = arith.constant 1.000000e+00 : f32
    %22 = vector.broadcast %cst_11 : f32 to vector<8x1xf32>
    %23 = arith.subf %22, %17 : vector<8x1xf32>
    %cst_12 = arith.constant 1.000000e+00 : f32
    %24 = vector.broadcast %cst_12 : f32 to vector<8x1xf32>
    %25 = arith.subf %24, %2 : vector<8x1xf32>
    %26 = arith.mulf %25, %21 : vector<8x1xf32>
    %27 = arith.mulf %26, %21 : vector<8x1xf32>
    %28 = arith.mulf %2, %23 : vector<8x1xf32>
    %29 = arith.mulf %28, %23 : vector<8x1xf32>
    %cst_13 = arith.constant 2.500000e-01 : f32
    %30 = vector.broadcast %cst_13 : f32 to vector<8x1xf32>
    %31 = arith.mulf %29, %30 : vector<8x1xf32>
    %32 = arith.addf %27, %31 : vector<8x1xf32>
    %c8_i32 = arith.constant 8 : i32
    %33 = arith.muli %arg0, %c8_i32 : i32
    %34 = tpu.iota {dimensions = array<i32: 0>} : vector<8x1xi32>
    %35 = vector.broadcast %33 : i32 to vector<8x1xi32>
    %36 = arith.addi %35, %34 : vector<8x1xi32>
    %c8_i32_14 = arith.constant 8 : i32
    %37 = vector.broadcast %c8_i32_14 : i32 to vector<8x1xi32>
    %38 = arith.cmpi slt, %36, %37 : vector<8x1xi32>
    %cst_15 = arith.constant 0.000000e+00 : f32
    %39 = vector.broadcast %cst_15 : f32 to vector<8x1xf32>
    %40 = arith.select %38, %32, %39 : vector<8x1xi1>, vector<8x1xf32>
    %c0_16 = arith.constant 0 : index
    %c0_17 = arith.constant 0 : index
    %41 = vector.load %arg4[%c0_16, %c0_17] : memref<8x1xf32, #tpu.memory_space<vmem>>, vector<8x1xf32>
    tpu.vector_store %arg4[%c0_16, %c0_17], %17 {strides = array<i32>} : memref<8x1xf32, #tpu.memory_space<vmem>>, vector<8x1xf32>,
    %c0_18 = arith.constant 0 : index
    %c0_19 = arith.constant 0 : index
    %42 = vector.load %arg5[%c0_18, %c0_19] : memref<8x1xf32, #tpu.memory_space<vmem>>, vector<8x1xf32>
    tpu.vector_store %arg5[%c0_18, %c0_19], %40 {strides = array<i32>} : memref<8x1xf32, #tpu.memory_space<vmem>>, vector<8x1xf32>,
    return
  }
  func.func @transform_0(%arg0: i32) -> (i32, i32) {
    %c0_i32 = arith.constant 0 : i32
    %c0_i32_0 = arith.constant 0 : i32
    return %arg0, %c0_i32 : i32, i32
  }
  func.func @transform_1(%arg0: i32) -> (i32, i32) {
    %c0_i32 = arith.constant 0 : i32
    %c0_i32_0 = arith.constant 0 : i32
    return %arg0, %c0_i32 : i32, i32
  }
  func.func @transform_2(%arg0: i32) -> (i32, i32) {
    %c0_i32 = arith.constant 0 : i32
    %c0_i32_0 = arith.constant 0 : i32
    return %arg0, %c0_i32 : i32, i32
  }
  func.func @transform_3(%arg0: i32) -> (i32, i32) {
    %c0_i32 = arith.constant 0 : i32
    %c0_i32_0 = arith.constant 0 : i32
    return %arg0, %c0_i32 : i32, i32
  }
  func.func @transform_4(%arg0: i32) -> (i32, i32) {
    %c0_i32 = arith.constant 0 : i32
    %c0_i32_0 = arith.constant 0 : i32
    return %arg0, %c0_i32 : i32, i32
  }
}

</mosaic_0001>

<bundles_post_ra>
// kernel: tpu_custom_call.1
= control target key start
LH: loop header
LB: loop body
LE: loop exit
PB: predicated region body
PF: predicated region fallthrough
CT: control target
= control target key end

     0   :  { %10 = vsyncpa [#allocation3], 0  ;;  %s102_s15 = smov [#allocation2]   ;;  %s143_s0 = inlined_call_operand.vmem [shape: f32[8,32], index: 0, kind: input, shape index: {}]   ;;  %s144_s1 = inlined_call_operand.hbm [shape: f32[8,32], index: 1, kind: input, shape index: {}]   ;;  %s145_s2 = inlined_call_operand.vmem [shape: f32[8,1], index: 2, kind: input, shape index: {}]   ;;  %s146_s3 = inlined_call_operand.vmem [shape: f32[8,1], index: 3, kind: output, shape index: {0}]   ;;  %s147_s4 = inlined_call_operand.vmem [shape: f32[8,1], index: 4, kind: output, shape index: {1}]  }
   0x1   :  { %s19_s16 = sshll.u32 %s102_s15, 4  ;;  %s20_s16 = int_to_ptr.vmem [resolvable:$true] %s19_s16 }
   0x2   :  { %s88_s17 = scalar_lea.vmem %s20_s16, 128  ;;  %p93_p1 = scmp.lt.s32.totalorder %s20_s16, %s20_s16 }
   0x3   :  { %p89_p0 = scmp.ne.s32.totalorder %s20_s16, %s88_s17  ;;  %p94_p2 = scmp.lt.s32.totalorder %s88_s17, %s88_s17 }
   0x5   :  { %p95_p3 = por %p94_p2, %p93_p1 }
   0x7   :  { %p96_p4 = pnand %p95_p3, %p89_p0 }
   0x9   :  { %99 = shalt.err (!%p96_p4)
}
   0xa   :  { %22 = dma.hbm_to_vmem [thread:$0]  %s144_s1, 128, %s20_s16, [#allocation3]  }
   0xb   :  { %100 = dma.done.wait [#allocation3], 128  }
   0xc   :  { %101 = vsyncadd [#allocation3], 4294967168  ;;  %v28_v0 = vld [vmem:[%s143_s0] sm:$0xff]  ;;  %vm32_vm0 = vcmask 261120   ;;  %vm65_vm1 = vcmask 7168  }
   0xd   :  { %v29_v1 = vld [vmem:[#allocation2] sm:$0xff]  ;;  %v36_v2 = vmul.f32 %v28_v0, %v28_v0 }
   0xe   :  { %v40_v3 = vmul.f32 %v29_v1, %v29_v1  ;;  %v31_v4 = vmul.f32 %v29_v1, %v28_v0  ;;  %v30_v14 = vld [vmem:[%s145_s2] sm:$0xff] }
   0xf   :  { %v37_v5 = vsel %vm32_vm0, %v36_v2, 0.0  ;;  %v51_v16 = vsub.f32 1.0, %v30_v14 }
  0x10   :  { %v33_v6 = vsel %vm32_vm0, %v31_v4, 0.0  ;;  %38 = vadd.xlane.f32.xlu0 %v37_v5  ;;  %v41_v7 = vsel %vm32_vm0, %v40_v3, 0.0 }
  0x11   :  { %34 = vadd.xlane.f32.xlu1 %v33_v6 }
  0x14   :  { %42 = vadd.xlane.f32.xlu0 %v41_v7 }
  0x99   :  { %v39_v8 = vpop.xlane.xlu0 %38 }
  0x9a   :  { %v35_v12 = vpop.xlane.xlu1 %34 }
  0x9d   :  { %v43_v9 = vpop.xlane.xlu0 %42 }
  0x9e   :  { %v44_v10 = vmul.f32 %v43_v9, %v39_v8 }
  0xa0   :  { %v45_v11 = vmax.f32 %v44_v10, 1e-16 }
  0xa2   :  { %78 = vrsqrt.f32 %v45_v11 }
  0xaf   :  { %v79_v13 = vpop.eup %78 }
  0xb0   :  { %v47_v15 = vmul.f32 %v79_v13, %v35_v12 }
  0xb2   :  { %v48_v17 = vsub.f32 0.5, %v47_v15  ;;  %v50_v18 = vsub.f32 1.0, %v47_v15  ;;  %66 = vst.msk [vmem:[%s146_s3] sm:$0xff] %vm65_vm1, %v47_v15 }
  0xb4   :  { %v49_v19 = vmax.f32 %v48_v17, 0.0  ;;  %v54_v20 = vmul.f32 %v50_v18, %v30_v14 }
  0xb6   :  { %v52_v21 = vmul.f32 %v51_v16, %v49_v19  ;;  %v55_v22 = vmul.f32 %v54_v20, %v50_v18 }
  0xb8   :  { %v53_v23 = vmul.f32 %v52_v21, %v49_v19  ;;  %v56_v24 = vmul.f32 0.25, %v55_v22 }
  0xba   :  { %v57_v25 = vadd.f32 %v56_v24, %v53_v23 }
  0xbc   :  { %67 = vst.msk [vmem:[%s147_s4] sm:$0xff] %vm65_vm1, %v57_v25 }
  0xbd   :  { %76 = vsyncpa [#allocation3], 1 }

</bundles_post_ra>
